<compile_context>
chip_gen: v7x
topology: tpu7x:2x2x1
jax: 0.10.0
libtpu: 0.0.40
codegen_flags: <defaults>
</compile_context>

<pallas_src>
import numpy as np
import jax
import jax.numpy as jnp
from jax.experimental import pallas as pl
from jax.experimental.pallas import tpu as pltpu


def mlp_edge_kernel(huv_ref, w1_ref, b1_ref, w2_ref, b2_ref, out_ref):
    # huv_ref : [2F, TE] bf16   stacked src/dst endpoint features (edges on lanes)
    # w1_ref  : [F, 2F]  bf16   full W1 (PyTorch [out, in] layout)
    # b1_ref  : [F, 1]   f32
    # w2_ref  : [F, 1]   f32    W2 row as a column vector
    # b2_ref  : [1, 1]   f32    (SMEM scalar)
    # out_ref : [1, TE]  f32    lane-dense scores
    hdn = jnp.dot(w1_ref[...], huv_ref[...],
                  preferred_element_type=jnp.float32)           # [F, TE] f32
    hdn = jnp.maximum(hdn + b1_ref[...], 0.0)                   # bias + ReLU (f32)
    # Second "matmul" (F -> 1): VPU multiply + sublane (XLU) reduction.
    s = jnp.sum(hdn * w2_ref[...], axis=0, keepdims=True)       # [1, TE]
    out_ref[...] = (s + b2_ref[0, 0]).astype(out_ref.dtype)


def mlp_predictor_forward(src, dst, h, w1, b1, w2, b2, *, tile_e=8192):
    """Per-edge MLP scores, shape [E] (== g.edata['score']).

    Parameters follow PyTorch nn.Linear layout:
      w1: [F, 2F], b1: [F], w2: [1, F], b2: [1];  h: [N, F].
    """
    E = int(src.shape[0])
    F_ = int(h.shape[1])
    if E == 0:
        return jnp.zeros((0,), jnp.float32)

    LANE = 128

    # --- tile size selection -------------------------------------------------
    # (a) keep at least 2 grid steps when E is big enough (v7x has 2 TCs and
    #     shards the "parallel" edge axis across them),
    # (b) cap so the double-buffered [2F, tile_e] bf16 stream stays <= ~24 MiB
    #     (v7x has only 64 MiB VMEM per TC).
    half_pad = -(-(-(-E // 2)) // LANE) * LANE                 # ceil(E/2) -> lane mult
    tile_e = max(LANE, min(int(tile_e), half_pad))
    bytes_per_col = 2 * F_ * 2                                  # [2F] bf16 column
    max_cols = (24 * 1024 * 1024) // (2 * bytes_per_col)        # 2 pipeline buffers
    max_cols = max(LANE, (max_cols // LANE) * LANE)
    tile_e = min(tile_e, max_cols)

    E_pad = -(-E // tile_e) * tile_e
    grid = (E_pad // tile_e,)

    # --- build the fused edge-feature stream (no big pad copies) -------------
    # Pad the *indices* (tiny) instead of the [F, E] gathers; node 0 is a valid
    # index, padded edges produce garbage scores that are sliced off below.
    src_p = jnp.pad(jnp.asarray(src, jnp.int32), (0, E_pad - E))
    dst_p = jnp.pad(jnp.asarray(dst, jnp.int32), (0, E_pad - E))

    hT = jnp.asarray(h, jnp.bfloat16).T                         # [F, N] (small)
    huv = jnp.concatenate([hT[:, src_p], hT[:, dst_p]], axis=0)  # [2F, E_pad] bf16

    # Parameters: MXU operand in bf16, everything else f32.
    w1_b = jnp.asarray(w1, jnp.bfloat16)                        # [F, 2F]
    b1c = jnp.asarray(b1, jnp.float32).reshape(F_, 1)           # [F, 1]
    w2c = jnp.asarray(w2, jnp.float32).reshape(F_, 1)           # [F, 1]
    b2c = jnp.asarray(b2, jnp.float32).reshape(1, 1)            # [1, 1]

    # Advisory cost hint: one K=2F matmul per edge + a few VPU ops; traffic is
    # dominated by the bf16 edge stream read + f32 score write.
    cost = pl.CostEstimate(
        flops=2 * (2 * F_) * F_ * E_pad + 4 * F_ * E_pad,
        transcendentals=0,
        bytes_accessed=(2 * F_ * E_pad) * 2 + E_pad * 4
                       + (F_ * 2 * F_) * 2 + 2 * F_ * 4 + 4,
    )

    out = pl.pallas_call(
        mlp_edge_kernel,
        out_shape=jax.ShapeDtypeStruct((1, E_pad), jnp.float32),
        grid_spec=pltpu.PrefetchScalarGridSpec(
            num_scalar_prefetch=0,
            grid=grid,
            in_specs=[
                pl.BlockSpec((2 * F_, tile_e), lambda i: (0, i)),   # fused huv tile
                pl.BlockSpec((F_, 2 * F_), lambda i: (0, 0)),       # W1 (constant)
                pl.BlockSpec((F_, 1), lambda i: (0, 0)),            # b1
                pl.BlockSpec((F_, 1), lambda i: (0, 0)),            # W2 column
                pl.BlockSpec(memory_space=pltpu.MemorySpace.SMEM),  # b2 scalar
            ],
            out_specs=pl.BlockSpec((1, tile_e), lambda i: (0, i)),  # lane-dense
        ),
        compiler_params=pltpu.CompilerParams(
            dimension_semantics=("parallel",),
            vmem_limit_bytes=48 * 1024 * 1024,
        ),
        cost_estimate=cost,
    )(huv, w1_b, b1c, w2c, b2c)

    return out[0, :E]   # drop padding; matches .squeeze(1)


if __name__ == "__main__":
    key = jax.random.PRNGKey(0)
    k_adj, k_h, k_w1, k_b1, k_w2, k_b2 = jax.random.split(key, 6)

    num_nodes = 8
    h_feats = 32

    # Graph construction mirrors the spec: adj = max(random, 0); edges = nonzero.
    adj_mat = np.asarray(jax.random.normal(k_adj, (num_nodes, num_nodes)))
    adj_mat = np.maximum(adj_mat, 0)
    src_np, dst_np = np.nonzero(adj_mat)
    src = jnp.asarray(src_np, dtype=jnp.int32)
    dst = jnp.asarray(dst_np, dtype=jnp.int32)

    # Node features.
    h = jax.random.normal(k_h, (num_nodes, h_feats), dtype=jnp.float32)

    # Parameters in PyTorch nn.Linear layout (weight: [out_features, in_features]).
    w1 = (jax.random.normal(k_w1, (h_feats, 2 * h_feats), dtype=jnp.float32)
          * (1.0 / np.sqrt(2 * h_feats)))
    b1 = jax.random.normal(k_b1, (h_feats,), dtype=jnp.float32) * 0.01
    w2 = (jax.random.normal(k_w2, (1, h_feats), dtype=jnp.float32)
          * (1.0 / np.sqrt(h_feats)))
    b2 = jax.random.normal(k_b2, (1,), dtype=jnp.float32) * 0.01

    score = mlp_predictor_forward(src, dst, h, w1, b1, w2, b2)
    score = jax.block_until_ready(score)

    # Reference (plain JAX) with the same bf16 casts on the streamed operands,
    # f32 everywhere else — matches the kernel's numerics.
    h_b = h.astype(jnp.bfloat16).astype(jnp.float32)
    w1_b = w1.astype(jnp.bfloat16).astype(jnp.float32)
    x_ref = jnp.concatenate([h_b[src], h_b[dst]], axis=1)
    hidden = jnp.maximum(x_ref @ w1_b.T + b1[None, :], 0.0)
    ref = (hidden @ w2.T + b2[None, :])[:, 0]

    np.testing.assert_allclose(np.asarray(score), np.asarray(ref),
                               rtol=1e-4, atol=1e-4)
    assert score.shape == (src.shape[0],)
    print("KERNEL_OK")
</pallas_src>

<mosaic_0001>
module attributes {stable_mosaic.version = 11 : i64} {
  func.func @mlp_edge_kernel(%arg0: i32, %arg1: memref<64x128xbf16, #tpu.memory_space<vmem>>, %arg2: memref<32x64xbf16, #tpu.memory_space<vmem>>, %arg3: memref<32x1xf32, #tpu.memory_space<vmem>>, %arg4: memref<32x1xf32, #tpu.memory_space<vmem>>, %arg5: memref<1x1xf32, #tpu.memory_space<smem>>, %arg6: memref<1x128xf32, #tpu.memory_space<vmem>>) attributes {dimension_semantics = [#tpu.dimension_semantics<parallel>], iteration_bounds = array<i64: 1>, scalar_prefetch = 0 : i64, scratch_operands = 0 : i64, tpu.core_type = #tpu.core_type<tc>, window_params = [{transform_indices = @transform_0, window_bounds = array<i64: 64, 128>}, {pipeline_mode = #tpu.pipeline_mode<synchronous>, transform_indices = @transform_1, window_bounds = array<i64: 32, 64>}, {pipeline_mode = #tpu.pipeline_mode<synchronous>, transform_indices = @transform_2, window_bounds = array<i64: 32, 1>}, {pipeline_mode = #tpu.pipeline_mode<synchronous>, transform_indices = @transform_3, window_bounds = array<i64: 32, 1>}, {transform_indices = @transform_4, window_bounds = array<i64: 1, 1>}, {transform_indices = @transform_5, window_bounds = array<i64: 1, 128>}]} {
    %c0 = arith.constant 0 : index
    %c0_0 = arith.constant 0 : index
    %0 = vector.load %arg2[%c0, %c0_0] : memref<32x64xbf16, #tpu.memory_space<vmem>>, vector<32x64xbf16>
    %c0_1 = arith.constant 0 : index
    %c0_2 = arith.constant 0 : index
    %1 = vector.load %arg1[%c0_1, %c0_2] : memref<64x128xbf16, #tpu.memory_space<vmem>>, vector<64x128xbf16>
    %cst = arith.constant dense<0.000000e+00> : vector<32x128xf32>
    %2 = tpu.matmul %0, %1, %cst {dimension_numbers = #tpu.dot_dimension_numbers<[1], [0], [0], [1], [0, 0, 1, 1], [], []>} : vector<32x64xbf16>, vector<64x128xbf16>, vector<32x128xf32> -> vector<32x128xf32>
    %c0_3 = arith.constant 0 : index
    %c0_4 = arith.constant 0 : index
    %3 = vector.load %arg3[%c0_3, %c0_4] : memref<32x1xf32, #tpu.memory_space<vmem>>, vector<32x1xf32>
    %4 = vector.broadcast %3 : vector<32x1xf32> to vector<32x128xf32>
    %5 = arith.addf %2, %4 : vector<32x128xf32>
    %cst_5 = arith.constant 0.000000e+00 : f32
    %6 = vector.broadcast %cst_5 : f32 to vector<32x128xf32>
    %7 = arith.maximumf %5, %6 : vector<32x128xf32>
    %c0_6 = arith.constant 0 : index
    %c0_7 = arith.constant 0 : index
    %8 = vector.load %arg4[%c0_6, %c0_7] : memref<32x1xf32, #tpu.memory_space<vmem>>, vector<32x1xf32>
    %9 = vector.broadcast %8 : vector<32x1xf32> to vector<32x128xf32>
    %10 = arith.mulf %7, %9 : vector<32x128xf32>
    %cst_8 = arith.constant dense<0.000000e+00> : vector<128xf32>
    %11 = vector.multi_reduction <add>, %10, %cst_8 [0] : vector<32x128xf32> to vector<128xf32>
    %12 = vector.shape_cast %11 : vector<128xf32> to vector<1x128xf32>
    %c0_9 = arith.constant 0 : index
    %c0_10 = arith.constant 0 : index
    %13 = memref.load %arg5[%c0_9, %c0_10] : memref<1x1xf32, #tpu.memory_space<smem>>
    %14 = vector.broadcast %13 : f32 to vector<1x128xf32>
    %15 = arith.addf %12, %14 : vector<1x128xf32>
    %c0_11 = arith.constant 0 : index
    %c0_12 = arith.constant 0 : index
    %16 = vector.load %arg6[%c0_11, %c0_12] : memref<1x128xf32, #tpu.memory_space<vmem>>, vector<1x128xf32>
    tpu.vector_store %arg6[%c0_11, %c0_12], %15 {strides = array<i32>} : memref<1x128xf32, #tpu.memory_space<vmem>>, vector<1x128xf32>,
    return
  }
  func.func @transform_0(%arg0: i32) -> (i32, i32) {
    %c0_i32 = arith.constant 0 : i32
    %c0_i32_0 = arith.constant 0 : i32
    return %c0_i32, %arg0 : i32, i32
  }
  func.func @transform_1(%arg0: i32) -> (i32, i32) {
    %c0_i32 = arith.constant 0 : i32
    %c0_i32_0 = arith.constant 0 : i32
    %c0_i32_1 = arith.constant 0 : i32
    return %c0_i32, %c0_i32_0 : i32, i32
  }
  func.func @transform_2(%arg0: i32) -> (i32, i32) {
    %c0_i32 = arith.constant 0 : i32
    %c0_i32_0 = arith.constant 0 : i32
    %c0_i32_1 = arith.constant 0 : i32
    return %c0_i32, %c0_i32_0 : i32, i32
  }
  func.func @transform_3(%arg0: i32) -> (i32, i32) {
    %c0_i32 = arith.constant 0 : i32
    %c0_i32_0 = arith.constant 0 : i32
    %c0_i32_1 = arith.constant 0 : i32
    return %c0_i32, %c0_i32_0 : i32, i32
  }
  func.func @transform_4(%arg0: i32) -> (i32, i32) {
    %c0_i32 = arith.constant 0 : i32
    %c0_i32_0 = arith.constant 0 : i32
    %c0_i32_1 = arith.constant 0 : i32
    return %c0_i32, %c0_i32_0 : i32, i32
  }
  func.func @transform_5(%arg0: i32) -> (i32, i32) {
    %c0_i32 = arith.constant 0 : i32
    %c0_i32_0 = arith.constant 0 : i32
    return %c0_i32, %arg0 : i32, i32
  }
}

</mosaic_0001>

<bundles_post_ra>
// kernel: tpu_custom_call.1
= control target key start
LH: loop header
LB: loop body
LE: loop exit
PB: predicated region body
PF: predicated region fallthrough
CT: control target
= control target key end

     0   :  { %v268_v2 = vmov 0   ;;  %vm93_vm0 = vcmask 523264   ;;  %s359_s0 = inlined_call_operand.vmem [shape: bf16[64,128], index: 0, kind: input, shape index: {}]   ;;  %s360_s1 = inlined_call_operand.vmem [shape: bf16[32,64], index: 1, kind: input, shape index: {}]   ;;  %s361_s2 = inlined_call_operand.vmem [shape: f32[32,1], index: 2, kind: input, shape index: {}]   ;;  %s362_s3 = inlined_call_operand.vmem [shape: f32[32,1], index: 3, kind: input, shape index: {}]   ;;  %s363_s4 = inlined_call_operand.<no memory space> [shape: f32[1,1], index: 4, kind: input, shape index: {}]   ;;  %s364_s5 = inlined_call_operand.hbm [shape: f32[1,128], index: 5, kind: output, shape index: {}]  }
   0x1   :  { %v238_v0 = vld [vmem:[%s359_s0] sm:$0xff]   ;;  %v239_v1 = vld [vmem:[%s359_s0 + $0x8] sm:$0xff]   ;;  %236 = vset.pattern.permute.xlu0 %v268_v2  ;;  %v240_v3 = vld [vmem:[%s359_s0 + $0x10] sm:$0xff]   ;;  %237 = vset.pattern.permute.xlu1 %v268_v2 }
   0x2   :  { %222 = vmatprep.subr.bf16.mxu0 %v238_v0  ;;  %v242_v4 = vld [vmem:[%s360_s1] sm:$0xff]   ;;  %v37_v6 = vld [vmem:[%s361_s2 + $0x10] sm:$0xff]  ;;  %v241_v7 = vld [vmem:[%s359_s0 + $0x18] sm:$0xff]  }
   0x3   :  { %223 = vmatpush3.bf16.msra.mxu0 %v238_v0  ;;  %230 = vmatprep.mubr.msk.bf16.mxu0 %vm93_vm0, %v242_v4  ;;  %v35_v5 = vld [vmem:[%s361_s2] sm:$0xff]  ;;  %v36_v8 = vld [vmem:[%s361_s2 + $0x8] sm:$0xff] }
   0x4   :  { %224 = vmatprep.subr.bf16.mxu0 %v239_v1  ;;  %41 = vperm.xlu0 %236, %v35_v5  }
   0x5   :  { %51 = vperm.xlu1 %237, %v37_v6  }
   0x7   :  { %225 = vmatpush3.bf16.msra.mxu0 %v239_v1 }
   0x8   :  { %226 = vmatprep.subr.bf16.mxu0 %v240_v3 }
   0x9   :  { %11 = vsyncpa [#allocation4], 0  ;;  %v38_v9 = vld [vmem:[%s361_s2 + $0x18] sm:$0xff]  ;;  %46 = vperm.xlu0 %236, %v36_v8   ;;  %v153_v10 = vld [vmem:[%s362_s3] sm:$0xff]  ;;  %v191_v47 = vstv %s363_s4  ;;  %s269_s19 = smov [#allocation3]  }
   0xa   :  { %56 = vperm.xlu1 %237, %v38_v9   ;;  %v154_v11 = vld [vmem:[%s362_s3 + $0x8] sm:$0xff]  ;;  %v155_v13 = vld [vmem:[%s362_s3 + $0x10] sm:$0xff]  ;;  %v156_v14 = vld [vmem:[%s362_s3 + $0x18] sm:$0xff]  ;;  %s200_s20 = sshll.u32 %s269_s19, 4  ;;  %s201_s20 = int_to_ptr.vmem [resolvable:$true] %s200_s20 }
   0xb   :  { %227 = vmatpush3.bf16.msra.mxu0 %v240_v3  ;;  %v243_v12 = vld [vmem:[%s360_s1 + $0x8] sm:$0xff]   ;;  %s244_s21 = scalar_lea.vmem %s201_s20, 16  ;;  %s248_s22 = scalar_lea.vmem %s201_s20, 32 }
   0xc   :  { %228 = vmatprep.subr.bf16.mxu0 %v241_v7  ;;  %p245_p0 = scmp.ne.s32.totalorder %s201_s20, %s244_s21  ;;  %p249_p1 = scmp.lt.s32.totalorder %s201_s20, %s201_s20 }
   0xd   :  { %159 = vperm.xlu0 %236, %v153_v10   ;;  %p250_p2 = scmp.lt.s32.totalorder %s248_s22, %s244_s21 }
   0xe   :  { %164 = vperm.xlu1 %237, %v154_v11  }
   0xf   :  { %229 = vmatpush3.bf16.msra.mxu0 %v241_v7  ;;  %p251_p3 = por %p250_p2, %p249_p1 }
  0x11   :  { %169 = vperm.xlu0 %236, %v155_v13   ;;  %p252_p4 = pnand %p251_p3, %p245_p0 }
  0x12   :  { %231 = vmatmul.mubr.msk.bf16.vlgmr.msra.gmra.mrb[0].mxu0 %vm93_vm0, %v243_v12  ;;  %174 = vperm.xlu1 %237, %v156_v14  }
  0x83   :  { %v42_v15 = vpop.permute.xlu0 %41 }
  0x84   :  { %v52_v16 = vpop.permute.xlu1 %51 }
  0x88   :  { %v47_v17 = vpop.permute.xlu0 %46 }
  0x89   :  { %v57_v18 = vpop.permute.xlu1 %56 }
  0x8c   :  { %v160_v24 = vpop.permute.xlu0 %159 }
  0x8d   :  { %v165_v29 = vpop.permute.xlu1 %164 }
  0x90   :  { %v170_v35 = vpop.permute.xlu0 %169 }
  0x91   :  { %v175_v38 = vpop.permute.xlu1 %174 }
  0xe5   :  { %v232_v19 = vpop.f32.mrb[0].mxu0 }
  0xe6   :  { %v134_v20 = vpop.f32.mrb[1].mxu0  ;;  %v143_v21 = vadd.f32 %v232_v19, %v52_v16 }
  0xe7   :  { %v135_v22 = vadd.f32 %v134_v20, %v42_v15  ;;  %v233_v23 = vpop.f32.mrb[2].mxu0 }
  0xe8   :  { %v137_v25 = vpop.f32.mrb[3].mxu0  ;;  %v146_v27 = vadd.f32 %v233_v23, %v57_v18  ;;  %v151_v30 = vmax.f32 %v143_v21, 0.0 }
  0xe9   :  { %v149_v26 = vmax.f32 %v135_v22, 0.0  ;;  %v138_v28 = vadd.f32 %v137_v25, %v47_v17 }
  0xea   :  { %v152_v33 = vmax.f32 %v146_v27, 0.0  ;;  %v179_v36 = vmul.f32 %v170_v35, %v151_v30 }
  0xeb   :  { %v150_v31 = vmax.f32 %v138_v28, 0.0  ;;  %v177_v32 = vmul.f32 %v160_v24, %v149_v26 }
  0xec   :  { %v180_v39 = vmul.f32 %v175_v38, %v152_v33 }
  0xed   :  { %v178_v34 = vmul.f32 %v165_v29, %v150_v31 }
  0xef   :  { %v181_v37 = vadd.f32 %v178_v34, %v177_v32 }
  0xf1   :  { %v182_v40 = vadd.f32 %v181_v37, %v179_v36 }
  0xf3   :  { %v183_v41 = vadd.f32 %v182_v40, %v180_v39 }
  0xf5   :  { %v184_v42 = vrot.slane %v183_v41, 4 }
  0xf7   :  { %v185_v43 = vadd.f32 %v184_v42, %v183_v41 }
  0xf9   :  { %v186_v44 = vrot.slane %v185_v43, 2 }
  0xfb   :  { %v187_v45 = vadd.f32 %v186_v44, %v185_v43 }
  0xfd   :  { %v188_v46 = vrot.slane %v187_v45, 1 }
  0xff   :  { %v189_v48 = vadd.f32 %v188_v46, %v187_v45 }
 0x101   :  { %v192_v49 = vadd.f32 %v191_v47, %v189_v48 }
 0x103   :  { %193 = vst [vmem:[#allocation3] sm:$0x1] %v192_v49 }
 0x104   :  { %255 = shalt.err (!%p252_p4)
}
 0x105   :  { %s256_s25 = scalar_lea.hbm %s364_s5, 16 }
 0x106   :  { %p257_p5 = scmp.ne.s32.totalorder %s364_s5, %s256_s25  ;;  %p260_p6 = scmp.lt.u32.totalorder %s256_s25, %s364_s5 }
 0x108   :  { %p262_p7 = pnand %p260_p6, %p257_p5 }
 0x10a   :  { %265 = shalt.err (!%p262_p7)
}
 0x10b   :  { %203 = dma.vmem_to_hbm [thread:$0]  %s201_s20, 16, %s364_s5, [#allocation4]  }
 0x10c   :  { %266 = dma.done.wait [#allocation4], 16  }
 0x10d   :  { %267 = vsyncadd [#allocation4], 4294967280 }
 0x10e   :  { %207 = vsyncpa [#allocation4], 1 }

</bundles_post_ra>
